<compile_context>
chip_gen: v6e
topology: v6e:2x2x1
jax: 0.10.0
libtpu: 0.0.40
codegen_flags: <defaults>
</compile_context>

<pallas_src>
import jax
import jax.numpy as jnp
from jax.experimental import pallas as pl
from jax.experimental.pallas import tpu as pltpu


def _output_logiqa_kernel(x_ref, w_ref, b_ref, o_ref):
    # Linear: (TB, H) @ (H, 4) with f32 accumulation on the MXU.
    logits = jnp.dot(x_ref[...], w_ref[...],
                     preferred_element_type=jnp.float32)
    logits = logits + b_ref[...].astype(jnp.float32)
    # log_softmax along the class axis (dim=1 of the (TB, 4) output).
    m = jnp.max(logits, axis=-1, keepdims=True)
    shifted = logits - m
    lse = jnp.log(jnp.sum(jnp.exp(shifted), axis=-1, keepdims=True))
    o_ref[...] = (shifted - lse).astype(o_ref.dtype)


def _round_up(n, m):
    return ((n + m - 1) // m) * m


def _choose_tile_b(b, h, itemsize):
    """Pick a batch tile size: multiple of 8, double-buffered x tiles under
    a conservative VMEM budget (safe for v7x), capped at 1024 rows."""
    budget = 24 * 1024 * 1024                 # bytes for 2 x-tile buffers
    tb = budget // max(1, 2 * h * itemsize)   # rows that fit the budget
    tb = max(8, (tb // 8) * 8)                # multiple of 8 sublanes
    tb = min(tb, 1024)                        # larger tiles add no BW benefit
    tb = min(tb, _round_up(b, 8))             # don't exceed the actual work
    return int(tb)


def output_logiqa_forward(x, w, b, mask=None):
    """x: (B, H) float32 or bfloat16, w: (4, H) (PyTorch Linear layout), b: (4,).

    mask is accepted for API parity with the PyTorch module but is unused.
    Returns (B, 4) float32 log-probabilities.
    """
    del mask  # unused, matches reference semantics

    B, H = x.shape
    x_dtype = x.dtype if x.dtype in (jnp.bfloat16, jnp.float32) else jnp.float32
    x = x.astype(x_dtype)
    w_t = jnp.asarray(w).astype(x_dtype).T            # (H, 4), same dtype as x
    b2d = jnp.asarray(b, jnp.float32).reshape(1, 4)   # bias in f32

    itemsize = jnp.dtype(x_dtype).itemsize
    TB = _choose_tile_b(B, H, itemsize)
    B_pad = _round_up(B, TB)
    if B_pad != B:
        x = jnp.pad(x, ((0, B_pad - B), (0, 0)))      # padded rows are discarded

    grid = (B_pad // TB,)

    out = pl.pallas_call(
        _output_logiqa_kernel,
        out_shape=jax.ShapeDtypeStruct((B_pad, 4), jnp.float32),
        grid_spec=pltpu.PrefetchScalarGridSpec(
            num_scalar_prefetch=0,
            grid=grid,
            in_specs=[
                pl.BlockSpec((TB, H), lambda i: (i, 0)),   # x tile (pipelined)
                pl.BlockSpec((H, 4), lambda i: (0, 0)),    # W^T (resident)
                pl.BlockSpec((1, 4), lambda i: (0, 0)),    # bias (resident)
            ],
            out_specs=pl.BlockSpec((TB, 4), lambda i: (i, 0)),
        ),
        compiler_params=pltpu.CompilerParams(
            dimension_semantics=("parallel",),   # shard batch tiles across TCs
            vmem_limit_bytes=32 * 1024 * 1024,
        ),
    )(x, w_t, b2d)

    return out[:B]


def _reference(x, w, b):
    logits = x.astype(jnp.float32) @ w.T.astype(jnp.float32) + b
    return jax.nn.log_softmax(logits, axis=1)


if __name__ == "__main__":
    key = jax.random.PRNGKey(0)
    k_x, k_w, k_b, k_m = jax.random.split(key, 4)

    B, H = 8, 32  # batch=8, hidden_size=32

    x = jax.random.normal(k_x, (B, H), dtype=jnp.float32)
    # Deterministic "Linear(hidden_size, 4)" parameters (uniform like PyTorch init)
    bound = 1.0 / (H ** 0.5)
    w = jax.random.uniform(k_w, (4, H), minval=-bound, maxval=bound,
                           dtype=jnp.float32)
    b = jax.random.uniform(k_b, (4,), minval=-bound, maxval=bound,
                           dtype=jnp.float32)
    mask = jax.random.bernoulli(k_m, 0.5, (B, H)).astype(jnp.float32)  # unused

    out = output_logiqa_forward(x, w, b, mask)
    jax.block_until_ready(out)

    ref = _reference(x, w, b)
    assert out.shape == (B, 4)
    assert jnp.allclose(out, ref, atol=1e-5, rtol=1e-5)

    # Also exercise a non-multiple-of-tile batch to check the padding path.
    B2 = 13
    x2 = jax.random.normal(k_m, (B2, H), dtype=jnp.float32)
    out2 = output_logiqa_forward(x2, w, b)
    jax.block_until_ready(out2)
    assert out2.shape == (B2, 4)
    assert jnp.allclose(out2, _reference(x2, w, b), atol=1e-5, rtol=1e-5)

    print("KERNEL_OK")
</pallas_src>

<mosaic_0001>
module attributes {stable_mosaic.version = 11 : i64} {
  func.func @_output_logiqa_kernel(%arg0: i32, %arg1: memref<8x32xf32, #tpu.memory_space<vmem>>, %arg2: memref<32x4xf32, #tpu.memory_space<vmem>>, %arg3: memref<1x4xf32, #tpu.memory_space<vmem>>, %arg4: memref<8x4xf32, #tpu.memory_space<vmem>>) attributes {dimension_semantics = [#tpu.dimension_semantics<parallel>], iteration_bounds = array<i64: 1>, scalar_prefetch = 0 : i64, scratch_operands = 0 : i64, tpu.core_type = #tpu.core_type<tc>, window_params = [{transform_indices = @transform_0, window_bounds = array<i64: 8, 32>}, {pipeline_mode = #tpu.pipeline_mode<synchronous>, transform_indices = @transform_1, window_bounds = array<i64: 32, 4>}, {pipeline_mode = #tpu.pipeline_mode<synchronous>, transform_indices = @transform_2, window_bounds = array<i64: 1, 4>}, {transform_indices = @transform_3, window_bounds = array<i64: 8, 4>}]} {
    %c0 = arith.constant 0 : index
    %c0_0 = arith.constant 0 : index
    %0 = vector.load %arg1[%c0, %c0_0] : memref<8x32xf32, #tpu.memory_space<vmem>>, vector<8x32xf32>
    %c0_1 = arith.constant 0 : index
    %c0_2 = arith.constant 0 : index
    %1 = vector.load %arg2[%c0_1, %c0_2] : memref<32x4xf32, #tpu.memory_space<vmem>>, vector<32x4xf32>
    %cst = arith.constant dense<0.000000e+00> : vector<8x4xf32>
    %2 = tpu.matmul %0, %1, %cst {dimension_numbers = #tpu.dot_dimension_numbers<[1], [0], [0], [1], [0, 0, 1, 1], [], []>} : vector<8x32xf32>, vector<32x4xf32>, vector<8x4xf32> -> vector<8x4xf32>
    %c0_3 = arith.constant 0 : index
    %c0_4 = arith.constant 0 : index
    %3 = vector.load %arg3[%c0_3, %c0_4] : memref<1x4xf32, #tpu.memory_space<vmem>>, vector<1x4xf32>
    %4 = vector.broadcast %3 : vector<1x4xf32> to vector<8x4xf32>
    %5 = arith.addf %2, %4 : vector<8x4xf32>
    %cst_5 = arith.constant dense<0xFF800000> : vector<8xf32>
    %6 = vector.multi_reduction <maximumf>, %5, %cst_5 [1] : vector<8x4xf32> to vector<8xf32>
    %7 = vector.shape_cast %6 : vector<8xf32> to vector<8x1xf32>
    %8 = vector.broadcast %7 : vector<8x1xf32> to vector<8x4xf32>
    %9 = arith.subf %5, %8 : vector<8x4xf32>
    %10 = math.exp %9 : vector<8x4xf32>
    %cst_6 = arith.constant dense<0.000000e+00> : vector<8xf32>
    %11 = vector.multi_reduction <add>, %10, %cst_6 [1] : vector<8x4xf32> to vector<8xf32>
    %12 = vector.shape_cast %11 : vector<8xf32> to vector<8x1xf32>
    %13 = math.log %12 : vector<8x1xf32>
    %14 = vector.broadcast %13 : vector<8x1xf32> to vector<8x4xf32>
    %15 = arith.subf %9, %14 : vector<8x4xf32>
    %c0_7 = arith.constant 0 : index
    %c0_8 = arith.constant 0 : index
    %16 = vector.load %arg4[%c0_7, %c0_8] : memref<8x4xf32, #tpu.memory_space<vmem>>, vector<8x4xf32>
    tpu.vector_store %arg4[%c0_7, %c0_8], %15 {strides = array<i32>} : memref<8x4xf32, #tpu.memory_space<vmem>>, vector<8x4xf32>,
    return
  }
  func.func @transform_0(%arg0: i32) -> (i32, i32) {
    %c0_i32 = arith.constant 0 : i32
    %c0_i32_0 = arith.constant 0 : i32
    return %arg0, %c0_i32 : i32, i32
  }
  func.func @transform_1(%arg0: i32) -> (i32, i32) {
    %c0_i32 = arith.constant 0 : i32
    %c0_i32_0 = arith.constant 0 : i32
    %c0_i32_1 = arith.constant 0 : i32
    return %c0_i32, %c0_i32_0 : i32, i32
  }
  func.func @transform_2(%arg0: i32) -> (i32, i32) {
    %c0_i32 = arith.constant 0 : i32
    %c0_i32_0 = arith.constant 0 : i32
    %c0_i32_1 = arith.constant 0 : i32
    return %c0_i32, %c0_i32_0 : i32, i32
  }
  func.func @transform_3(%arg0: i32) -> (i32, i32) {
    %c0_i32 = arith.constant 0 : i32
    %c0_i32_0 = arith.constant 0 : i32
    return %arg0, %c0_i32 : i32, i32
  }
}

</mosaic_0001>

<bundles_post_ra>
// kernel: tpu_custom_call.1
= control target key start
LH: loop header
LB: loop body
LE: loop exit
PB: predicated region body
PF: predicated region fallthrough
CT: control target
= control target key end

     0   :  { %v142_v0 = vmov 0.0   ;;  %vm143_vm0 = vmmov 0   ;;  %vm26_vm1 = vcmask 261120   ;;  %vm100_vm2 = vcmask 31744   ;;  %s188_s1 = inlined_call_operand.vmem [shape: f32[32,4], index: 1, kind: input, shape index: {}]   ;;  %s189_s0 = inlined_call_operand.vmem [shape: f32[8,32], index: 0, kind: input, shape index: {}]   ;;  %s190_s2 = inlined_call_operand.vmem [shape: f32[1,4], index: 2, kind: input, shape index: {}]   ;;  %s191_s3 = inlined_call_operand.vmem [shape: f32[8,4], index: 3, kind: output, shape index: {}]  }
   0x1   :  { %125 = vmatprep.subr.mxu0 %v142_v0  ;;  %v18_v1 = vld [vmem:[%s188_s1 + $0x18] sm:$0xff]  ;;  %v17_v2 = vld [vmem:[%s188_s1 + $0x10] sm:$0xff]  ;;  %133 = vmatprep.mubr.msk.f32.mxu0 %vm143_vm0, %v142_v0  ;;  %v16_v3 = vld [vmem:[%s188_s1 + $0x8] sm:$0xff] }
   0x2   :  { %126 = vmatpush3.msra.mxu0 %v18_v1  ;;  %v15_v4 = vld [vmem:[%s188_s1] sm:$0xff] }
   0x3   :  { %127 = vmatprep.subr.mxu0 %v142_v0  ;;  %v14_v5 = vld [vmem:[%s189_s0] sm:$0xff] }
   0x4   :  { %128 = vmatpush3.msra.mxu0 %v17_v2  ;;  %v118_v6 = vld [vmem:[%s190_s2] ss:$0 sm:$0xff] }
   0x5   :  { %129 = vmatprep.subr.mxu0 %v142_v0 }
   0x6   :  { %130 = vmatpush3.msra.mxu0 %v16_v3 }
   0x7   :  { %131 = vmatprep.subr.mxu0 %v142_v0 }
   0x8   :  { %132 = vmatpush3.msra.mxu0 %v15_v4 }
   0x9   :  { %134 = vmatmul.mubr.msk.f32.vlgmr.msra.gmra.mxu0 %vm26_vm1, %v14_v5 }
  0xc9   :  { %v96_v7 = vpop.f32.mrf.mxu0 }
  0xca   :  { %v97_v8 = vadd.f32 %v118_v6, %v96_v7 }
  0xcb   :  { %v135_v9 = vpop.f32.mrf.mxu0 }
  0xcc   :  { %v101_v10 = vsel %vm100_vm2, %v97_v8, -inf }
  0xcd   :  { %102 = vmax.xlane.f32.xlu0 %v101_v10 }
 0x156   :  { %v103_v11 = vpop.xlane.xlu0 %102 }
 0x157   :  { %v104_v12 = vsub.f32 %v97_v8, %v103_v11 }
 0x159   :  { %v105_v13 = vmul.f32 1.442695, %v104_v12 }
 0x15b   :  { %138 = vpow2.f32 %v105_v13 }
 0x168   :  { %v139_v14 = vpop.eup %138 }
 0x169   :  { %v107_v15 = vsel %vm100_vm2, %v139_v14, 0.0 }
 0x16a   :  { %108 = vadd.xlane.f32.xlu0 %v107_v15 }
 0x1f3   :  { %v109_v16 = vpop.xlane.xlu0 %108 }
 0x1f4   :  { %140 = vlog2.f32 %v109_v16 }
 0x201   :  { %v141_v17 = vpop.eup %140 }
 0x202   :  { %v111_v18 = vmul.f32 0.6931472, %v141_v17 }
 0x204   :  { %v112_v19 = vsub.f32 %v104_v12, %v111_v18 }
 0x206   :  { %113 = vst.msk [vmem:[%s191_s3] sm:$0xff] %vm100_vm2, %v112_v19 }

</bundles_post_ra>
